<compile_context>
chip_gen: v7x
topology: tpu7x:2x2x1
jax: 0.10.0
libtpu: 0.0.40
codegen_flags: <defaults>
</compile_context>

<pallas_src>
import math

import jax
import jax.numpy as jnp
from jax.experimental import pallas as pl
from jax.experimental.pallas import tpu as pltpu


# ----------------------------- example dims ----------------------------------
N_BATCH = 2      # N
T_SEQ   = 8      # T
E_DIM   = 32     # E (embedding)
N_HEAD  = 4      # heads
D_FF    = 128    # MLP hidden


def _layer_norm(x, gamma, beta, eps=1e-5):
    mu = jnp.mean(x, axis=-1, keepdims=True)
    var = jnp.mean(jnp.square(x - mu), axis=-1, keepdims=True)
    return (x - mu) * jax.lax.rsqrt(var + eps) * gamma + beta


# ------------------------------- kernel ---------------------------------------
def _make_decoder_block_kernel(N, T, E, H, D_ff):
    """Build the fused decoder-block kernel with shapes baked in via closure."""
    assert E % H == 0, "embedding dim must be divisible by the head count"
    D = E // H
    scale = 1.0 / math.sqrt(D)

    def kernel(z_ref, wqkv_ref, wo_ref, w1_ref, w2_ref, pk_ref, out_ref):
        # Single invocation (no grid); batch+seq folded into the matmul M dim.
        z = z_ref[...].astype(jnp.float32)                    # (N*T, E)

        pk = pk_ref[...]                                      # (8, >=128) packed params
        bqkv  = pk[0:1, :3 * E]
        bo    = pk[1:2, :E]
        ln1_g = pk[2:3, :E]
        ln1_b = pk[3:4, :E]
        ln2_g = pk[4:5, :E]
        ln2_b = pk[5:6, :E]
        b1    = pk[6:7, :D_ff]
        b2    = pk[7:8, :E]

        # ---- masked multi-head self-attention (pre-LN) ----
        h = _layer_norm(z, ln1_g, ln1_b)                      # (N*T, E)
        qkv = jnp.dot(h, wqkv_ref[...],
                      preferred_element_type=jnp.float32) + bqkv   # (N*T, 3E)
        q = qkv[:, 0 * E:1 * E]
        k = qkv[:, 1 * E:2 * E]
        v = qkv[:, 2 * E:3 * E]

        # Causal ("future") mask generated in-kernel, additive form (no DMA).
        rows = jax.lax.broadcasted_iota(jnp.int32, (T, T), 0)
        cols = jax.lax.broadcasted_iota(jnp.int32, (T, T), 1)
        neg_mask = jnp.where(rows >= cols, 0.0, -1e30).astype(jnp.float32)

        # Static (batch, head) loops with column slices: no head transposes.
        batch_outs = []
        for b in range(N):
            qb = q[b * T:(b + 1) * T, :]
            kb = k[b * T:(b + 1) * T, :]
            vb = v[b * T:(b + 1) * T, :]
            head_outs = []
            for hh in range(H):
                qh = qb[:, hh * D:(hh + 1) * D]               # (T, D)
                kh = kb[:, hh * D:(hh + 1) * D]
                vh = vb[:, hh * D:(hh + 1) * D]
                # q @ k^T without materializing a transpose (trans_b path).
                s = jax.lax.dot_general(
                    qh, kh, (((1,), (1,)), ((), ())),
                    preferred_element_type=jnp.float32) * scale + neg_mask
                s = s - jnp.max(s, axis=-1, keepdims=True)
                p = jnp.exp(s)
                p = p * pl.reciprocal(jnp.sum(p, axis=-1, keepdims=True),
                                      approx=True)
                head_outs.append(
                    jnp.dot(p, vh, preferred_element_type=jnp.float32))
            batch_outs.append(jnp.concatenate(head_outs, axis=-1))   # (T, E)
        attn = jnp.concatenate(batch_outs, axis=0)                    # (N*T, E)
        attn = jnp.dot(attn, wo_ref[...],
                       preferred_element_type=jnp.float32) + bo

        z = z + attn                                          # residual 1

        # ---- position-wise feed-forward (pre-LN) ----
        h2 = _layer_norm(z, ln2_g, ln2_b)
        f = jnp.dot(h2, w1_ref[...],
                    preferred_element_type=jnp.float32) + b1          # (N*T, D_ff)
        # TODO(synk): torch nn.GELU defaults to exact erf; tanh approximation used here.
        f = jax.nn.gelu(f, approximate=True)
        f = jnp.dot(f, w2_ref[...],
                    preferred_element_type=jnp.float32) + b2          # (N*T, E)

        z = z + f                                             # residual 2
        out_ref[...] = z.astype(out_ref.dtype)

    return kernel


# ------------------------------- wrapper --------------------------------------
def decoder_block(z, params, *, n_head):
    """Fused decoder block. z: (N, T, E) float32. Causal mask applied in-kernel."""
    # TODO(synk): target_padding_masks / encoder cross-attention from the abstract
    # BaseDecoder signature are not implemented (causal/future mask only).
    N, T, E = z.shape
    D_ff = params["w1"].shape[1]

    # Pack all small 1-D params (biases + LN scales) into one lane-padded slab
    # so the kernel prologue issues a single DMA instead of eight tiny ones.
    width = ((max(3 * E, D_ff, E) + 127) // 128) * 128
    pk = jnp.zeros((8, width), jnp.float32)
    pk = pk.at[0, :3 * E].set(params["bqkv"])
    pk = pk.at[1, :E].set(params["bo"])
    pk = pk.at[2, :E].set(params["ln1_g"])
    pk = pk.at[3, :E].set(params["ln1_b"])
    pk = pk.at[4, :E].set(params["ln2_g"])
    pk = pk.at[5, :E].set(params["ln2_b"])
    pk = pk.at[6, :D_ff].set(params["b1"])
    pk = pk.at[7, :E].set(params["b2"])

    kernel = _make_decoder_block_kernel(N, T, E, n_head, D_ff)

    vmem = pl.BlockSpec(memory_space=pltpu.MemorySpace.VMEM)  # whole array in VMEM
    out2d = pl.pallas_call(
        kernel,
        out_shape=jax.ShapeDtypeStruct((N * T, E), z.dtype),
        in_specs=[vmem] * 6,
        out_specs=vmem,
    )(
        z.reshape(N * T, E),      # free metadata reshape outside the kernel
        params["wqkv"], params["wo"], params["w1"], params["w2"], pk,
    )
    return out2d.reshape(N, T, E)


# ------------------------- pure-JAX reference ---------------------------------
def decoder_block_ref(z, p, *, n_head):
    N, T, E = z.shape
    D = E // n_head
    mask = jnp.tril(jnp.ones((T, T), dtype=bool))

    def one(zb):
        h = _layer_norm(zb, p["ln1_g"], p["ln1_b"])
        qkv = h @ p["wqkv"] + p["bqkv"]
        q, k, v = jnp.split(qkv, 3, axis=-1)
        q = jnp.transpose(q.reshape(T, n_head, D), (1, 0, 2))
        k = jnp.transpose(k.reshape(T, n_head, D), (1, 0, 2))
        v = jnp.transpose(v.reshape(T, n_head, D), (1, 0, 2))
        s = jnp.einsum("htd,hsd->hts", q, k) / jnp.sqrt(jnp.float32(D))
        s = jnp.where(mask[None], s, -1e30)
        a = jax.nn.softmax(s, axis=-1)
        o = jnp.einsum("hts,hsd->htd", a, v)
        o = jnp.transpose(o, (1, 0, 2)).reshape(T, E) @ p["wo"] + p["bo"]
        zb = zb + o
        h2 = _layer_norm(zb, p["ln2_g"], p["ln2_b"])
        f = jax.nn.gelu(h2 @ p["w1"] + p["b1"], approximate=True) @ p["w2"] + p["b2"]
        return zb + f

    return jax.vmap(one)(z)


# --------------------------------- main ----------------------------------------
if __name__ == "__main__":
    key = jax.random.PRNGKey(0)
    ks = jax.random.split(key, 8)

    z = jax.random.normal(ks[0], (N_BATCH, T_SEQ, E_DIM), dtype=jnp.float32)

    s = 0.02
    params = {
        "wqkv": s * jax.random.normal(ks[1], (E_DIM, 3 * E_DIM), jnp.float32),
        "bqkv": jnp.zeros((3 * E_DIM,), jnp.float32),
        "wo":   s * jax.random.normal(ks[2], (E_DIM, E_DIM), jnp.float32),
        "bo":   jnp.zeros((E_DIM,), jnp.float32),
        "ln1_g": jnp.ones((E_DIM,), jnp.float32),
        "ln1_b": jnp.zeros((E_DIM,), jnp.float32),
        "ln2_g": jnp.ones((E_DIM,), jnp.float32),
        "ln2_b": jnp.zeros((E_DIM,), jnp.float32),
        "w1":   s * jax.random.normal(ks[3], (E_DIM, D_FF), jnp.float32),
        "b1":   jnp.zeros((D_FF,), jnp.float32),
        "w2":   s * jax.random.normal(ks[4], (D_FF, E_DIM), jnp.float32),
        "b2":   jnp.zeros((E_DIM,), jnp.float32),
    }

    out = decoder_block(z, params, n_head=N_HEAD)
    out = jax.block_until_ready(out)

    ref = decoder_block_ref(z, params, n_head=N_HEAD)
    assert out.shape == (N_BATCH, T_SEQ, E_DIM)
    # slightly looser than 1e-4: kernel uses the EUP approximate reciprocal
    assert jnp.allclose(out, ref, atol=1e-3, rtol=1e-3), "mismatch vs reference"

    print("KERNEL_OK")
</pallas_src>

<mosaic_0001>
module attributes {stable_mosaic.version = 11 : i64} {
  func.func @kernel(%arg0: memref<16x32xf32, #tpu.memory_space<vmem>>, %arg1: memref<32x96xf32, #tpu.memory_space<vmem>>, %arg2: memref<32x32xf32, #tpu.memory_space<vmem>>, %arg3: memref<32x128xf32, #tpu.memory_space<vmem>>, %arg4: memref<128x32xf32, #tpu.memory_space<vmem>>, %arg5: memref<8x128xf32, #tpu.memory_space<vmem>>, %arg6: memref<16x32xf32, #tpu.memory_space<vmem>>) attributes {dimension_semantics = [], scalar_prefetch = 0 : i64, scratch_operands = 0 : i64, tpu.core_type = #tpu.core_type<tc>} {
    %c0 = arith.constant 0 : index
    %c0_0 = arith.constant 0 : index
    %0 = vector.load %arg0[%c0, %c0_0] : memref<16x32xf32, #tpu.memory_space<vmem>>, vector<16x32xf32>
    %c0_1 = arith.constant 0 : index
    %c0_2 = arith.constant 0 : index
    %1 = vector.load %arg5[%c0_1, %c0_2] : memref<8x128xf32, #tpu.memory_space<vmem>>, vector<8x128xf32>
    %2 = vector.extract_strided_slice %1 {offsets = [0, 0], sizes = [1, 96], strides = [1, 1]} : vector<8x128xf32> to vector<1x96xf32>
    %3 = vector.extract_strided_slice %1 {offsets = [1, 0], sizes = [1, 32], strides = [1, 1]} : vector<8x128xf32> to vector<1x32xf32>
    %4 = vector.extract_strided_slice %1 {offsets = [2, 0], sizes = [1, 32], strides = [1, 1]} : vector<8x128xf32> to vector<1x32xf32>
    %5 = vector.extract_strided_slice %1 {offsets = [3, 0], sizes = [1, 32], strides = [1, 1]} : vector<8x128xf32> to vector<1x32xf32>
    %6 = vector.extract_strided_slice %1 {offsets = [4, 0], sizes = [1, 32], strides = [1, 1]} : vector<8x128xf32> to vector<1x32xf32>
    %7 = vector.extract_strided_slice %1 {offsets = [5, 0], sizes = [1, 32], strides = [1, 1]} : vector<8x128xf32> to vector<1x32xf32>
    %8 = vector.extract_strided_slice %1 {offsets = [6, 0], sizes = [1, 128], strides = [1, 1]} : vector<8x128xf32> to vector<1x128xf32>
    %9 = vector.extract_strided_slice %1 {offsets = [7, 0], sizes = [1, 32], strides = [1, 1]} : vector<8x128xf32> to vector<1x32xf32>
    %cst = arith.constant dense<0.000000e+00> : vector<16xf32>
    %10 = vector.multi_reduction <add>, %0, %cst [1] : vector<16x32xf32> to vector<16xf32>
    %11 = vector.shape_cast %10 : vector<16xf32> to vector<16x1xf32>
    %cst_3 = arith.constant 3.200000e+01 : f32
    %12 = vector.broadcast %cst_3 : f32 to vector<16x1xf32>
    %13 = arith.divf %11, %12 : vector<16x1xf32>
    %14 = vector.broadcast %13 : vector<16x1xf32> to vector<16x32xf32>
    %15 = arith.subf %0, %14 : vector<16x32xf32>
    %16 = arith.mulf %15, %15 : vector<16x32xf32>
    %cst_4 = arith.constant dense<0.000000e+00> : vector<16xf32>
    %17 = vector.multi_reduction <add>, %16, %cst_4 [1] : vector<16x32xf32> to vector<16xf32>
    %18 = vector.shape_cast %17 : vector<16xf32> to vector<16x1xf32>
    %cst_5 = arith.constant 3.200000e+01 : f32
    %19 = vector.broadcast %cst_5 : f32 to vector<16x1xf32>
    %20 = arith.divf %18, %19 : vector<16x1xf32>
    %21 = vector.broadcast %13 : vector<16x1xf32> to vector<16x32xf32>
    %22 = arith.subf %0, %21 : vector<16x32xf32>
    %cst_6 = arith.constant 9.99999974E-6 : f32
    %23 = vector.broadcast %cst_6 : f32 to vector<16x1xf32>
    %24 = arith.addf %20, %23 : vector<16x1xf32>
    %25 = math.rsqrt %24 : vector<16x1xf32>
    %26 = vector.broadcast %25 : vector<16x1xf32> to vector<16x32xf32>
    %27 = arith.mulf %22, %26 : vector<16x32xf32>
    %28 = vector.broadcast %4 : vector<1x32xf32> to vector<16x32xf32>
    %29 = arith.mulf %27, %28 : vector<16x32xf32>
    %30 = vector.broadcast %5 : vector<1x32xf32> to vector<16x32xf32>
    %31 = arith.addf %29, %30 : vector<16x32xf32>
    %c0_7 = arith.constant 0 : index
    %c0_8 = arith.constant 0 : index
    %32 = vector.load %arg1[%c0_7, %c0_8] : memref<32x96xf32, #tpu.memory_space<vmem>>, vector<32x96xf32>
    %cst_9 = arith.constant dense<0.000000e+00> : vector<16x96xf32>
    %33 = tpu.matmul %31, %32, %cst_9 {dimension_numbers = #tpu.dot_dimension_numbers<[1], [0], [0], [1], [0, 0, 1, 1], [], []>} : vector<16x32xf32>, vector<32x96xf32>, vector<16x96xf32> -> vector<16x96xf32>
    %34 = vector.broadcast %2 : vector<1x96xf32> to vector<16x96xf32>
    %35 = arith.addf %33, %34 : vector<16x96xf32>
    %36 = vector.extract_strided_slice %35 {offsets = [0, 0], sizes = [16, 32], strides = [1, 1]} : vector<16x96xf32> to vector<16x32xf32>
    %37 = vector.extract_strided_slice %35 {offsets = [0, 32], sizes = [16, 32], strides = [1, 1]} : vector<16x96xf32> to vector<16x32xf32>
    %38 = vector.extract_strided_slice %35 {offsets = [0, 64], sizes = [16, 32], strides = [1, 1]} : vector<16x96xf32> to vector<16x32xf32>
    %39 = tpu.iota {dimensions = array<i32: 0>} : vector<8x8xi32>
    %40 = tpu.iota {dimensions = array<i32: 1>} : vector<8x8xi32>
    %41 = arith.cmpi sge, %39, %40 : vector<8x8xi32>
    %cst_10 = arith.constant 0.000000e+00 : f32
    %cst_11 = arith.constant -1.000000e+30 : f32
    %42 = vector.broadcast %cst_10 : f32 to vector<8x8xf32>
    %43 = vector.broadcast %cst_11 : f32 to vector<8x8xf32>
    %44 = arith.select %41, %42, %43 : vector<8x8xi1>, vector<8x8xf32>
    %45 = vector.extract_strided_slice %36 {offsets = [0, 0], sizes = [8, 32], strides = [1, 1]} : vector<16x32xf32> to vector<8x32xf32>
    %46 = vector.extract_strided_slice %37 {offsets = [0, 0], sizes = [8, 32], strides = [1, 1]} : vector<16x32xf32> to vector<8x32xf32>
    %47 = vector.extract_strided_slice %38 {offsets = [0, 0], sizes = [8, 32], strides = [1, 1]} : vector<16x32xf32> to vector<8x32xf32>
    %48 = vector.extract_strided_slice %45 {offsets = [0, 0], sizes = [8, 8], strides = [1, 1]} : vector<8x32xf32> to vector<8x8xf32>
    %49 = vector.extract_strided_slice %46 {offsets = [0, 0], sizes = [8, 8], strides = [1, 1]} : vector<8x32xf32> to vector<8x8xf32>
    %50 = vector.extract_strided_slice %47 {offsets = [0, 0], sizes = [8, 8], strides = [1, 1]} : vector<8x32xf32> to vector<8x8xf32>
    %cst_12 = arith.constant dense<0.000000e+00> : vector<8x8xf32>
    %51 = tpu.matmul %48, %49, %cst_12 {dimension_numbers = #tpu.dot_dimension_numbers<[1], [1], [0], [0], [0, 0, 1, 0], [], []>} : vector<8x8xf32>, vector<8x8xf32>, vector<8x8xf32> -> vector<8x8xf32>
    %cst_13 = arith.constant 0.353553385 : f32
    %52 = vector.broadcast %cst_13 : f32 to vector<8x8xf32>
    %53 = arith.mulf %51, %52 : vector<8x8xf32>
    %54 = arith.addf %53, %44 : vector<8x8xf32>
    %cst_14 = arith.constant dense<0xFF800000> : vector<8xf32>
    %55 = vector.multi_reduction <maximumf>, %54, %cst_14 [1] : vector<8x8xf32> to vector<8xf32>
    %56 = vector.shape_cast %55 : vector<8xf32> to vector<8x1xf32>
    %57 = vector.broadcast %56 : vector<8x1xf32> to vector<8x8xf32>
    %58 = arith.subf %54, %57 : vector<8x8xf32>
    %59 = math.exp %58 : vector<8x8xf32>
    %cst_15 = arith.constant dense<0.000000e+00> : vector<8xf32>
    %60 = vector.multi_reduction <add>, %59, %cst_15 [1] : vector<8x8xf32> to vector<8xf32>
    %61 = vector.shape_cast %60 : vector<8xf32> to vector<8x1xf32>
    %62 = tpu.reciprocal %61 {approx = true} : vector<8x1xf32> -> vector<8x1xf32>
    %63 = vector.broadcast %62 : vector<8x1xf32> to vector<8x8xf32>
    %64 = arith.mulf %59, %63 : vector<8x8xf32>
    %cst_16 = arith.constant dense<0.000000e+00> : vector<8x8xf32>
    %65 = tpu.matmul %64, %50, %cst_16 {dimension_numbers = #tpu.dot_dimension_numbers<[1], [0], [0], [1], [0, 0, 1, 1], [], []>} : vector<8x8xf32>, vector<8x8xf32>, vector<8x8xf32> -> vector<8x8xf32>
    %66 = vector.extract_strided_slice %45 {offsets = [0, 8], sizes = [8, 8], strides = [1, 1]} : vector<8x32xf32> to vector<8x8xf32>
    %67 = vector.extract_strided_slice %46 {offsets = [0, 8], sizes = [8, 8], strides = [1, 1]} : vector<8x32xf32> to vector<8x8xf32>
    %68 = vector.extract_strided_slice %47 {offsets = [0, 8], sizes = [8, 8], strides = [1, 1]} : vector<8x32xf32> to vector<8x8xf32>
    %cst_17 = arith.constant dense<0.000000e+00> : vector<8x8xf32>
    %69 = tpu.matmul %66, %67, %cst_17 {dimension_numbers = #tpu.dot_dimension_numbers<[1], [1], [0], [0], [0, 0, 1, 0], [], []>} : vector<8x8xf32>, vector<8x8xf32>, vector<8x8xf32> -> vector<8x8xf32>
    %cst_18 = arith.constant 0.353553385 : f32
    %70 = vector.broadcast %cst_18 : f32 to vector<8x8xf32>
    %71 = arith.mulf %69, %70 : vector<8x8xf32>
    %72 = arith.addf %71, %44 : vector<8x8xf32>
    %cst_19 = arith.constant dense<0xFF800000> : vector<8xf32>
    %73 = vector.multi_reduction <maximumf>, %72, %cst_19 [1] : vector<8x8xf32> to vector<8xf32>
    %74 = vector.shape_cast %73 : vector<8xf32> to vector<8x1xf32>
    %75 = vector.broadcast %74 : vector<8x1xf32> to vector<8x8xf32>
    %76 = arith.subf %72, %75 : vector<8x8xf32>
    %77 = math.exp %76 : vector<8x8xf32>
    %cst_20 = arith.constant dense<0.000000e+00> : vector<8xf32>
    %78 = vector.multi_reduction <add>, %77, %cst_20 [1] : vector<8x8xf32> to vector<8xf32>
    %79 = vector.shape_cast %78 : vector<8xf32> to vector<8x1xf32>
    %80 = tpu.reciprocal %79 {approx = true} : vector<8x1xf32> -> vector<8x1xf32>
    %81 = vector.broadcast %80 : vector<8x1xf32> to vector<8x8xf32>
    %82 = arith.mulf %77, %81 : vector<8x8xf32>
    %cst_21 = arith.constant dense<0.000000e+00> : vector<8x8xf32>
    %83 = tpu.matmul %82, %68, %cst_21 {dimension_numbers = #tpu.dot_dimension_numbers<[1], [0], [0], [1], [0, 0, 1, 1], [], []>} : vector<8x8xf32>, vector<8x8xf32>, vector<8x8xf32> -> vector<8x8xf32>
    %84 = vector.extract_strided_slice %45 {offsets = [0, 16], sizes = [8, 8], strides = [1, 1]} : vector<8x32xf32> to vector<8x8xf32>
    %85 = vector.extract_strided_slice %46 {offsets = [0, 16], sizes = [8, 8], strides = [1, 1]} : vector<8x32xf32> to vector<8x8xf32>
    %86 = vector.extract_strided_slice %47 {offsets = [0, 16], sizes = [8, 8], strides = [1, 1]} : vector<8x32xf32> to vector<8x8xf32>
    %cst_22 = arith.constant dense<0.000000e+00> : vector<8x8xf32>
    %87 = tpu.matmul %84, %85, %cst_22 {dimension_numbers = #tpu.dot_dimension_numbers<[1], [1], [0], [0], [0, 0, 1, 0], [], []>} : vector<8x8xf32>, vector<8x8xf32>, vector<8x8xf32> -> vector<8x8xf32>
    %cst_23 = arith.constant 0.353553385 : f32
    %88 = vector.broadcast %cst_23 : f32 to vector<8x8xf32>
    %89 = arith.mulf %87, %88 : vector<8x8xf32>
    %90 = arith.addf %89, %44 : vector<8x8xf32>
    %cst_24 = arith.constant dense<0xFF800000> : vector<8xf32>
    %91 = vector.multi_reduction <maximumf>, %90, %cst_24 [1] : vector<8x8xf32> to vector<8xf32>
    %92 = vector.shape_cast %91 : vector<8xf32> to vector<8x1xf32>
    %93 = vector.broadcast %92 : vector<8x1xf32> to vector<8x8xf32>
    %94 = arith.subf %90, %93 : vector<8x8xf32>
    %95 = math.exp %94 : vector<8x8xf32>
    %cst_25 = arith.constant dense<0.000000e+00> : vector<8xf32>
    %96 = vector.multi_reduction <add>, %95, %cst_25 [1] : vector<8x8xf32> to vector<8xf32>
    %97 = vector.shape_cast %96 : vector<8xf32> to vector<8x1xf32>
    %98 = tpu.reciprocal %97 {approx = true} : vector<8x1xf32> -> vector<8x1xf32>
    %99 = vector.broadcast %98 : vector<8x1xf32> to vector<8x8xf32>
    %100 = arith.mulf %95, %99 : vector<8x8xf32>
    %cst_26 = arith.constant dense<0.000000e+00> : vector<8x8xf32>
    %101 = tpu.matmul %100, %86, %cst_26 {dimension_numbers = #tpu.dot_dimension_numbers<[1], [0], [0], [1], [0, 0, 1, 1], [], []>} : vector<8x8xf32>, vector<8x8xf32>, vector<8x8xf32> -> vector<8x8xf32>
    %102 = vector.extract_strided_slice %45 {offsets = [0, 24], sizes = [8, 8], strides = [1, 1]} : vector<8x32xf32> to vector<8x8xf32>
    %103 = vector.extract_strided_slice %46 {offsets = [0, 24], sizes = [8, 8], strides = [1, 1]} : vector<8x32xf32> to vector<8x8xf32>
    %104 = vector.extract_strided_slice %47 {offsets = [0, 24], sizes = [8, 8], strides = [1, 1]} : vector<8x32xf32> to vector<8x8xf32>
    %cst_27 = arith.constant dense<0.000000e+00> : vector<8x8xf32>
    %105 = tpu.matmul %102, %103, %cst_27 {dimension_numbers = #tpu.dot_dimension_numbers<[1], [1], [0], [0], [0, 0, 1, 0], [], []>} : vector<8x8xf32>, vector<8x8xf32>, vector<8x8xf32> -> vector<8x8xf32>
    %cst_28 = arith.constant 0.353553385 : f32
    %106 = vector.broadcast %cst_28 : f32 to vector<8x8xf32>
    %107 = arith.mulf %105, %106 : vector<8x8xf32>
    %108 = arith.addf %107, %44 : vector<8x8xf32>
    %cst_29 = arith.constant dense<0xFF800000> : vector<8xf32>
    %109 = vector.multi_reduction <maximumf>, %108, %cst_29 [1] : vector<8x8xf32> to vector<8xf32>
    %110 = vector.shape_cast %109 : vector<8xf32> to vector<8x1xf32>
    %111 = vector.broadcast %110 : vector<8x1xf32> to vector<8x8xf32>
    %112 = arith.subf %108, %111 : vector<8x8xf32>
    %113 = math.exp %112 : vector<8x8xf32>
    %cst_30 = arith.constant dense<0.000000e+00> : vector<8xf32>
    %114 = vector.multi_reduction <add>, %113, %cst_30 [1] : vector<8x8xf32> to vector<8xf32>
    %115 = vector.shape_cast %114 : vector<8xf32> to vector<8x1xf32>
    %116 = tpu.reciprocal %115 {approx = true} : vector<8x1xf32> -> vector<8x1xf32>
    %117 = vector.broadcast %116 : vector<8x1xf32> to vector<8x8xf32>
    %118 = arith.mulf %113, %117 : vector<8x8xf32>
    %cst_31 = arith.constant dense<0.000000e+00> : vector<8x8xf32>
    %119 = tpu.matmul %118, %104, %cst_31 {dimension_numbers = #tpu.dot_dimension_numbers<[1], [0], [0], [1], [0, 0, 1, 1], [], []>} : vector<8x8xf32>, vector<8x8xf32>, vector<8x8xf32> -> vector<8x8xf32>
    %120 = tpu.concatenate %65, %83, %101, %119 in 1 : vector<8x8xf32>, vector<8x8xf32>, vector<8x8xf32>, vector<8x8xf32> -> vector<8x32xf32>
    %121 = vector.extract_strided_slice %36 {offsets = [8, 0], sizes = [8, 32], strides = [1, 1]} : vector<16x32xf32> to vector<8x32xf32>
    %122 = vector.extract_strided_slice %37 {offsets = [8, 0], sizes = [8, 32], strides = [1, 1]} : vector<16x32xf32> to vector<8x32xf32>
    %123 = vector.extract_strided_slice %38 {offsets = [8, 0], sizes = [8, 32], strides = [1, 1]} : vector<16x32xf32> to vector<8x32xf32>
    %124 = vector.extract_strided_slice %121 {offsets = [0, 0], sizes = [8, 8], strides = [1, 1]} : vector<8x32xf32> to vector<8x8xf32>
    %125 = vector.extract_strided_slice %122 {offsets = [0, 0], sizes = [8, 8], strides = [1, 1]} : vector<8x32xf32> to vector<8x8xf32>
    %126 = vector.extract_strided_slice %123 {offsets = [0, 0], sizes = [8, 8], strides = [1, 1]} : vector<8x32xf32> to vector<8x8xf32>
    %cst_32 = arith.constant dense<0.000000e+00> : vector<8x8xf32>
    %127 = tpu.matmul %124, %125, %cst_32 {dimension_numbers = #tpu.dot_dimension_numbers<[1], [1], [0], [0], [0, 0, 1, 0], [], []>} : vector<8x8xf32>, vector<8x8xf32>, vector<8x8xf32> -> vector<8x8xf32>
    %cst_33 = arith.constant 0.353553385 : f32
    %128 = vector.broadcast %cst_33 : f32 to vector<8x8xf32>
    %129 = arith.mulf %127, %128 : vector<8x8xf32>
    %130 = arith.addf %129, %44 : vector<8x8xf32>
    %cst_34 = arith.constant dense<0xFF800000> : vector<8xf32>
    %131 = vector.multi_reduction <maximumf>, %130, %cst_34 [1] : vector<8x8xf32> to vector<8xf32>
    %132 = vector.shape_cast %131 : vector<8xf32> to vector<8x1xf32>
    %133 = vector.broadcast %132 : vector<8x1xf32> to vector<8x8xf32>
    %134 = arith.subf %130, %133 : vector<8x8xf32>
    %135 = math.exp %134 : vector<8x8xf32>
    %cst_35 = arith.constant dense<0.000000e+00> : vector<8xf32>
    %136 = vector.multi_reduction <add>, %135, %cst_35 [1] : vector<8x8xf32> to vector<8xf32>
    %137 = vector.shape_cast %136 : vector<8xf32> to vector<8x1xf32>
    %138 = tpu.reciprocal %137 {approx = true} : vector<8x1xf32> -> vector<8x1xf32>
    %139 = vector.broadcast %138 : vector<8x1xf32> to vector<8x8xf32>
    %140 = arith.mulf %135, %139 : vector<8x8xf32>
    %cst_36 = arith.constant dense<0.000000e+00> : vector<8x8xf32>
    %141 = tpu.matmul %140, %126, %cst_36 {dimension_numbers = #tpu.dot_dimension_numbers<[1], [0], [0], [1], [0, 0, 1, 1], [], []>} : vector<8x8xf32>, vector<8x8xf32>, vector<8x8xf32> -> vector<8x8xf32>
    %142 = vector.extract_strided_slice %121 {offsets = [0, 8], sizes = [8, 8], strides = [1, 1]} : vector<8x32xf32> to vector<8x8xf32>
    %143 = vector.extract_strided_slice %122 {offsets = [0, 8], sizes = [8, 8], strides = [1, 1]} : vector<8x32xf32> to vector<8x8xf32>
    %144 = vector.extract_strided_slice %123 {offsets = [0, 8], sizes = [8, 8], strides = [1, 1]} : vector<8x32xf32> to vector<8x8xf32>
    %cst_37 = arith.constant dense<0.000000e+00> : vector<8x8xf32>
    %145 = tpu.matmul %142, %143, %cst_37 {dimension_numbers = #tpu.dot_dimension_numbers<[1], [1], [0], [0], [0, 0, 1, 0], [], []>} : vector<8x8xf32>, vector<8x8xf32>, vector<8x8xf32> -> vector<8x8xf32>
    %cst_38 = arith.constant 0.353553385 : f32
    %146 = vector.broadcast %cst_38 : f32 to vector<8x8xf32>
    %147 = arith.mulf %145, %146 : vector<8x8xf32>
    %148 = arith.addf %147, %44 : vector<8x8xf32>
    %cst_39 = arith.constant dense<0xFF800000> : vector<8xf32>
    %149 = vector.multi_reduction <maximumf>, %148, %cst_39 [1] : vector<8x8xf32> to vector<8xf32>
    %150 = vector.shape_cast %149 : vector<8xf32> to vector<8x1xf32>
    %151 = vector.broadcast %150 : vector<8x1xf32> to vector<8x8xf32>
    %152 = arith.subf %148, %151 : vector<8x8xf32>
    %153 = math.exp %152 : vector<8x8xf32>
    %cst_40 = arith.constant dense<0.000000e+00> : vector<8xf32>
    %154 = vector.multi_reduction <add>, %153, %cst_40 [1] : vector<8x8xf32> to vector<8xf32>
    %155 = vector.shape_cast %154 : vector<8xf32> to vector<8x1xf32>
    %156 = tpu.reciprocal %155 {approx = true} : vector<8x1xf32> -> vector<8x1xf32>
    %157 = vector.broadcast %156 : vector<8x1xf32> to vector<8x8xf32>
    %158 = arith.mulf %153, %157 : vector<8x8xf32>
    %cst_41 = arith.constant dense<0.000000e+00> : vector<8x8xf32>
    %159 = tpu.matmul %158, %144, %cst_41 {dimension_numbers = #tpu.dot_dimension_numbers<[1], [0], [0], [1], [0, 0, 1, 1], [], []>} : vector<8x8xf32>, vector<8x8xf32>, vector<8x8xf32> -> vector<8x8xf32>
    %160 = vector.extract_strided_slice %121 {offsets = [0, 16], sizes = [8, 8], strides = [1, 1]} : vector<8x32xf32> to vector<8x8xf32>
    %161 = vector.extract_strided_slice %122 {offsets = [0, 16], sizes = [8, 8], strides = [1, 1]} : vector<8x32xf32> to vector<8x8xf32>
    %162 = vector.extract_strided_slice %123 {offsets = [0, 16], sizes = [8, 8], strides = [1, 1]} : vector<8x32xf32> to vector<8x8xf32>
    %cst_42 = arith.constant dense<0.000000e+00> : vector<8x8xf32>
    %163 = tpu.matmul %160, %161, %cst_42 {dimension_numbers = #tpu.dot_dimension_numbers<[1], [1], [0], [0], [0, 0, 1, 0], [], []>} : vector<8x8xf32>, vector<8x8xf32>, vector<8x8xf32> -> vector<8x8xf32>
    %cst_43 = arith.constant 0.353553385 : f32
    %164 = vector.broadcast %cst_43 : f32 to vector<8x8xf32>
    %165 = arith.mulf %163, %164 : vector<8x8xf32>
    %166 = arith.addf %165, %44 : vector<8x8xf32>
    %cst_44 = arith.constant dense<0xFF800000> : vector<8xf32>
    %167 = vector.multi_reduction <maximumf>, %166, %cst_44 [1] : vector<8x8xf32> to vector<8xf32>
    %168 = vector.shape_cast %167 : vector<8xf32> to vector<8x1xf32>
    %169 = vector.broadcast %168 : vector<8x1xf32> to vector<8x8xf32>
    %170 = arith.subf %166, %169 : vector<8x8xf32>
    %171 = math.exp %170 : vector<8x8xf32>
    %cst_45 = arith.constant dense<0.000000e+00> : vector<8xf32>
    %172 = vector.multi_reduction <add>, %171, %cst_45 [1] : vector<8x8xf32> to vector<8xf32>
    %173 = vector.shape_cast %172 : vector<8xf32> to vector<8x1xf32>
    %174 = tpu.reciprocal %173 {approx = true} : vector<8x1xf32> -> vector<8x1xf32>
    %175 = vector.broadcast %174 : vector<8x1xf32> to vector<8x8xf32>
    %176 = arith.mulf %171, %175 : vector<8x8xf32>
    %cst_46 = arith.constant dense<0.000000e+00> : vector<8x8xf32>
    %177 = tpu.matmul %176, %162, %cst_46 {dimension_numbers = #tpu.dot_dimension_numbers<[1], [0], [0], [1], [0, 0, 1, 1], [], []>} : vector<8x8xf32>, vector<8x8xf32>, vector<8x8xf32> -> vector<8x8xf32>
    %178 = vector.extract_strided_slice %121 {offsets = [0, 24], sizes = [8, 8], strides = [1, 1]} : vector<8x32xf32> to vector<8x8xf32>
    %179 = vector.extract_strided_slice %122 {offsets = [0, 24], sizes = [8, 8], strides = [1, 1]} : vector<8x32xf32> to vector<8x8xf32>
    %180 = vector.extract_strided_slice %123 {offsets = [0, 24], sizes = [8, 8], strides = [1, 1]} : vector<8x32xf32> to vector<8x8xf32>
    %cst_47 = arith.constant dense<0.000000e+00> : vector<8x8xf32>
    %181 = tpu.matmul %178, %179, %cst_47 {dimension_numbers = #tpu.dot_dimension_numbers<[1], [1], [0], [0], [0, 0, 1, 0], [], []>} : vector<8x8xf32>, vector<8x8xf32>, vector<8x8xf32> -> vector<8x8xf32>
    %cst_48 = arith.constant 0.353553385 : f32
    %182 = vector.broadcast %cst_48 : f32 to vector<8x8xf32>
    %183 = arith.mulf %181, %182 : vector<8x8xf32>
    %184 = arith.addf %183, %44 : vector<8x8xf32>
    %cst_49 = arith.constant dense<0xFF800000> : vector<8xf32>
    %185 = vector.multi_reduction <maximumf>, %184, %cst_49 [1] : vector<8x8xf32> to vector<8xf32>
    %186 = vector.shape_cast %185 : vector<8xf32> to vector<8x1xf32>
    %187 = vector.broadcast %186 : vector<8x1xf32> to vector<8x8xf32>
    %188 = arith.subf %184, %187 : vector<8x8xf32>
    %189 = math.exp %188 : vector<8x8xf32>
    %cst_50 = arith.constant dense<0.000000e+00> : vector<8xf32>
    %190 = vector.multi_reduction <add>, %189, %cst_50 [1] : vector<8x8xf32> to vector<8xf32>
    %191 = vector.shape_cast %190 : vector<8xf32> to vector<8x1xf32>
    %192 = tpu.reciprocal %191 {approx = true} : vector<8x1xf32> -> vector<8x1xf32>
    %193 = vector.broadcast %192 : vector<8x1xf32> to vector<8x8xf32>
    %194 = arith.mulf %189, %193 : vector<8x8xf32>
    %cst_51 = arith.constant dense<0.000000e+00> : vector<8x8xf32>
    %195 = tpu.matmul %194, %180, %cst_51 {dimension_numbers = #tpu.dot_dimension_numbers<[1], [0], [0], [1], [0, 0, 1, 1], [], []>} : vector<8x8xf32>, vector<8x8xf32>, vector<8x8xf32> -> vector<8x8xf32>
    %196 = tpu.concatenate %141, %159, %177, %195 in 1 : vector<8x8xf32>, vector<8x8xf32>, vector<8x8xf32>, vector<8x8xf32> -> vector<8x32xf32>
    %197 = tpu.concatenate %120, %196 in 0 : vector<8x32xf32>, vector<8x32xf32> -> vector<16x32xf32>
    %c0_52 = arith.constant 0 : index
    %c0_53 = arith.constant 0 : index
    %198 = vector.load %arg2[%c0_52, %c0_53] : memref<32x32xf32, #tpu.memory_space<vmem>>, vector<32x32xf32>
    %cst_54 = arith.constant dense<0.000000e+00> : vector<16x32xf32>
    %199 = tpu.matmul %197, %198, %cst_54 {dimension_numbers = #tpu.dot_dimension_numbers<[1], [0], [0], [1], [0, 0, 1, 1], [], []>} : vector<16x32xf32>, vector<32x32xf32>, vector<16x32xf32> -> vector<16x32xf32>
    %200 = vector.broadcast %3 : vector<1x32xf32> to vector<16x32xf32>
    %201 = arith.addf %199, %200 : vector<16x32xf32>
    %202 = arith.addf %0, %201 : vector<16x32xf32>
    %cst_55 = arith.constant dense<0.000000e+00> : vector<16xf32>
    %203 = vector.multi_reduction <add>, %202, %cst_55 [1] : vector<16x32xf32> to vector<16xf32>
    %204 = vector.shape_cast %203 : vector<16xf32> to vector<16x1xf32>
    %cst_56 = arith.constant 3.200000e+01 : f32
    %205 = vector.broadcast %cst_56 : f32 to vector<16x1xf32>
    %206 = arith.divf %204, %205 : vector<16x1xf32>
    %207 = vector.broadcast %206 : vector<16x1xf32> to vector<16x32xf32>
    %208 = arith.subf %202, %207 : vector<16x32xf32>
    %209 = arith.mulf %208, %208 : vector<16x32xf32>
    %cst_57 = arith.constant dense<0.000000e+00> : vector<16xf32>
    %210 = vector.multi_reduction <add>, %209, %cst_57 [1] : vector<16x32xf32> to vector<16xf32>
    %211 = vector.shape_cast %210 : vector<16xf32> to vector<16x1xf32>
    %cst_58 = arith.constant 3.200000e+01 : f32
    %212 = vector.broadcast %cst_58 : f32 to vector<16x1xf32>
    %213 = arith.divf %211, %212 : vector<16x1xf32>
    %214 = vector.broadcast %206 : vector<16x1xf32> to vector<16x32xf32>
    %215 = arith.subf %202, %214 : vector<16x32xf32>
    %cst_59 = arith.constant 9.99999974E-6 : f32
    %216 = vector.broadcast %cst_59 : f32 to vector<16x1xf32>
    %217 = arith.addf %213, %216 : vector<16x1xf32>
    %218 = math.rsqrt %217 : vector<16x1xf32>
    %219 = vector.broadcast %218 : vector<16x1xf32> to vector<16x32xf32>
    %220 = arith.mulf %215, %219 : vector<16x32xf32>
    %221 = vector.broadcast %6 : vector<1x32xf32> to vector<16x32xf32>
    %222 = arith.mulf %220, %221 : vector<16x32xf32>
    %223 = vector.broadcast %7 : vector<1x32xf32> to vector<16x32xf32>
    %224 = arith.addf %222, %223 : vector<16x32xf32>
    %c0_60 = arith.constant 0 : index
    %c0_61 = arith.constant 0 : index
    %225 = vector.load %arg3[%c0_60, %c0_61] : memref<32x128xf32, #tpu.memory_space<vmem>>, vector<32x128xf32>
    %cst_62 = arith.constant dense<0.000000e+00> : vector<16x128xf32>
    %226 = tpu.matmul %224, %225, %cst_62 {dimension_numbers = #tpu.dot_dimension_numbers<[1], [0], [0], [1], [0, 0, 1, 1], [], []>} : vector<16x32xf32>, vector<32x128xf32>, vector<16x128xf32> -> vector<16x128xf32>
    %227 = vector.broadcast %8 : vector<1x128xf32> to vector<16x128xf32>
    %228 = arith.addf %226, %227 : vector<16x128xf32>
    %229 = arith.mulf %228, %228 : vector<16x128xf32>
    %230 = arith.mulf %228, %229 : vector<16x128xf32>
    %cst_63 = arith.constant 4.471500e-02 : f32
    %231 = vector.broadcast %cst_63 : f32 to vector<16x128xf32>
    %232 = arith.mulf %231, %230 : vector<16x128xf32>
    %233 = arith.addf %228, %232 : vector<16x128xf32>
    %cst_64 = arith.constant 0.797884583 : f32
    %234 = vector.broadcast %cst_64 : f32 to vector<16x128xf32>
    %235 = arith.mulf %234, %233 : vector<16x128xf32>
    %236 = math.tanh %235 : vector<16x128xf32>
    %cst_65 = arith.constant 1.000000e+00 : f32
    %237 = vector.broadcast %cst_65 : f32 to vector<16x128xf32>
    %238 = arith.addf %237, %236 : vector<16x128xf32>
    %cst_66 = arith.constant 5.000000e-01 : f32
    %239 = vector.broadcast %cst_66 : f32 to vector<16x128xf32>
    %240 = arith.mulf %239, %238 : vector<16x128xf32>
    %241 = arith.mulf %228, %240 : vector<16x128xf32>
    %c0_67 = arith.constant 0 : index
    %c0_68 = arith.constant 0 : index
    %242 = vector.load %arg4[%c0_67, %c0_68] : memref<128x32xf32, #tpu.memory_space<vmem>>, vector<128x32xf32>
    %cst_69 = arith.constant dense<0.000000e+00> : vector<16x32xf32>
    %243 = tpu.matmul %241, %242, %cst_69 {dimension_numbers = #tpu.dot_dimension_numbers<[1], [0], [0], [1], [0, 0, 1, 1], [], []>} : vector<16x128xf32>, vector<128x32xf32>, vector<16x32xf32> -> vector<16x32xf32>
    %244 = vector.broadcast %9 : vector<1x32xf32> to vector<16x32xf32>
    %245 = arith.addf %243, %244 : vector<16x32xf32>
    %246 = arith.addf %202, %245 : vector<16x32xf32>
    %c0_70 = arith.constant 0 : index
    %c0_71 = arith.constant 0 : index
    %247 = vector.load %arg6[%c0_70, %c0_71] : memref<16x32xf32, #tpu.memory_space<vmem>>, vector<16x32xf32>
    tpu.vector_store %arg6[%c0_70, %c0_71], %246 {strides = array<i32>} : memref<16x32xf32, #tpu.memory_space<vmem>>, vector<16x32xf32>,
    return
  }
}

</mosaic_0001>

<bundles_post_ra>
// kernel: tpu_custom_call.1
= control target key start
LH: loop header
LB: loop body
LE: loop exit
PB: predicated region body
PF: predicated region fallthrough
CT: control target
= control target key end

     0   :  { %vm27_vm0 = vcmask 261120   ;;  %s2636_s0 = inlined_call_operand.vmem [shape: f32[16,32], index: 0, kind: input, shape index: {}]   ;;  %s2637_s1 = inlined_call_operand.vmem [shape: f32[32,96], index: 1, kind: input, shape index: {}]   ;;  %s2638_s2 = inlined_call_operand.vmem [shape: f32[32,32], index: 2, kind: input, shape index: {}]   ;;  %s2639_s3 = inlined_call_operand.vmem [shape: f32[32,128], index: 3, kind: input, shape index: {}]   ;;  %s2640_s4 = inlined_call_operand.vmem [shape: f32[128,32], index: 4, kind: input, shape index: {}]   ;;  %s2641_s5 = inlined_call_operand.vmem [shape: f32[8,128], index: 5, kind: input, shape index: {}]   ;;  %s2642_s6 = inlined_call_operand.hbm [shape: f32[16,32], index: 6, kind: output, shape index: {}]  }
   0x1   :  { %v2326_v0 = vld [vmem:[%s2636_s0] sm:$0xff]  ;;  %v2331_v1 = vld [vmem:[%s2636_s0 + $0x8] sm:$0xff] }
   0x2   :  { %11 = vsyncpa [#allocation3], 0  ;;  %v28_v2 = vsel %vm27_vm0, %v2326_v0, 0.0  ;;  %v31_v3 = vsel %vm27_vm0, %v2331_v1, 0.0  ;;  %v67_v14 = vld [vmem:[%s2637_s1] sm:$0xff]  ;;  %v68_v15 = vld [vmem:[%s2637_s1 + $0x8] sm:$0xff]  ;;  %v55_v22 = vlaneseq }
   0x3   :  { %29 = vadd.xlane.f32.xlu0 %v28_v2  ;;  %v69_v16 = vld [vmem:[%s2637_s1 + $0x10] sm:$0xff]  ;;  %v2126_v17 = vpack.c.bf16 %v68_v15, %v67_v14  ;;  %v70_v18 = vld [vmem:[%s2637_s1 + $0x18] sm:$0xff]  ;;  %v2360_v29 = vld [vmem:[%s2641_s5] sm:$0xff]  ;;  %v2269_v41 = vmov 0.0   ;;  %vm2270_vm1 = vmmov 0   ;;  %s2271_s5 = smov 88  }
   0x4   :  { %v2130_v19 = vpack.c.bf16 %v70_v18, %v69_v16  ;;  %v2354_v26 = vshrl.u32 %v55_v22, 7  ;;  %1999 = vmatprep.subr.mxu0 %v2269_v41  ;;  %2001 = vmatprep.mubr.msk.f32.mxu0 %vm2270_vm1, %v2269_v41  ;;  %s2272_s9 = smov 96   ;;  %s2273_s10 = smov 120   ;;  %vm165_vm2 = vcmask 64512   ;;  %v159_v62 = vand.u32 127, %v55_v22 }
   0x5   :  { %2127 = vmatprep.subr.bf16.mxu1 %v2126_v17  ;;  %s2274_s11 = smov 112   ;;  %s2275_s12 = smov 80   ;;  %v2278_v2 = vmov -1e+30   ;;  %vm843_vm4 = vcmask 130048   ;;  %vm845_vm5 = vcmask 195584  }
   0x6   :  { %2129 = vmatpush3.bf16.msra.mxu1 %v2126_v17  ;;  %v57_v28 = vsub.s32 2, %v2354_v26  ;;  %v63_v30 = vsub.s32 3, %v2354_v26  ;;  %v73_v42 = vsub.s32 0, %v2354_v26  ;;  %s2276_s13 = smov 104   ;;  %s2277_s14 = smov 72   ;;  %vm160_vm3 = vcmp.ge.s32.totalorder %v2354_v26, %v159_v62 }
   0x7   :  { %32 = vadd.xlane.f32.xlu0 %v31_v3  ;;  %2131 = vmatprep.subr.bf16.mxu1 %v2130_v19  ;;  %v161_v3 = vsel %vm160_vm3, 0.0, %v2278_v2  ;;  %s2279_s15 = smov 64   ;;  %s2280_s16 = smov 48  }
   0x8   :  { %v58_v31 = vrot.slane %v2360_v29, %v57_v28  ;;  %v64_v34 = vrot.slane %v2360_v29, %v63_v30  ;;  %v74_v43 = vrot.slane %v2360_v29, %v73_v42  ;;  %s2281_s17 = smov 40   ;;  %s2282_s18 = smov 56  }
   0x9   :  { %s2283_s19 = smov 8   ;;  %s2284_s24 = smov 16  }
   0xa   :  { %2133 = vmatpush3.bf16.msra.mxu1 %v2130_v19  ;;  %s2285_s28 = smov 24  }
   0xb   :  { %1989 = vmatprep.subr.mxu1 %v2269_v41 }
  0x90   :  { %v30_v4 = vpop.xlane.xlu0 %29 }
  0x91   :  { %v35_v5 = vmul.f32 0.03125, %v30_v4 }
  0x93   :  { %v37_v6 = vsub.f32 %v2326_v0, %v35_v5 }
  0x94   :  { %v33_v7 = vpop.xlane.xlu0 %32 }
  0x95   :  { %v36_v8 = vmul.f32 0.03125, %v33_v7  ;;  %v39_v9 = vmul.f32 %v37_v6, %v37_v6 }
  0x97   :  { %v38_v10 = vsub.f32 %v2331_v1, %v36_v8  ;;  %v41_v11 = vsel %vm27_vm0, %v39_v9, 0.0 }
  0x98   :  { %42 = vadd.xlane.f32.xlu1 %v41_v11 }
  0x99   :  { %v40_v12 = vmul.f32 %v38_v10, %v38_v10 }
  0x9b   :  { %v44_v13 = vsel %vm27_vm0, %v40_v12, 0.0 }
  0x9c   :  { %45 = vadd.xlane.f32.xlu1 %v44_v13 }
 0x125   :  { %v43_v20 = vpop.xlane.xlu1 %42 }
 0x126   :  { %v47_v21 = vmul.f32 0.03125, %v43_v20 }
 0x128   :  { %v49_v23 = vadd.f32 1e-05, %v47_v21 }
 0x129   :  { %v46_v24 = vpop.xlane.xlu1 %45 }
 0x12a   :  { %2201 = vrsqrt.f32 %v49_v23  ;;  %v48_v25 = vmul.f32 0.03125, %v46_v24 }
 0x12c   :  { %v50_v27 = vadd.f32 1e-05, %v48_v25 }
 0x12e   :  { %2203 = vrsqrt.f32 %v50_v27 }
 0x134   :  { %v2202_v32 = vpop.eup %2201 }
 0x135   :  { %v53_v33 = vmul.f32 %v2202_v32, %v37_v6 }
 0x137   :  { %v59_v35 = vmul.f32 %v58_v31, %v53_v33 }
 0x138   :  { %v2204_v36 = vpop.eup %2203 }
 0x139   :  { %v54_v37 = vmul.f32 %v2204_v36, %v38_v10  ;;  %v65_v38 = vadd.f32 %v64_v34, %v59_v35 }
 0x13b   :  { %v60_v39 = vmul.f32 %v58_v31, %v54_v37  ;;  %1986 = vmatprep.mubr.msk.f32.mxu1 %vm27_vm0, %v65_v38 }
 0x13d   :  { %v66_v40 = vadd.f32 %v64_v34, %v60_v39 }
 0x13f   :  { %1987 = vmatmul.mubr.msk.f32.vlgmr.msra.gmra.mrb[0].mxu1 %vm27_vm0, %v66_v40 }
 0x140   :  { %1991 = vmatprep.mubr.msk.f32.mxu1 %vm2270_vm1, %v2269_v41 }
 0x212   :  { %v1988_v44 = vpop.f32.mrb[0].mxu1 }
 0x213   :  { %v147_v45 = vpop.f32.mrb[1].mxu1  ;;  %v2383_v47 = vadd.f32 %v1988_v44, %v74_v43 }
 0x214   :  { %v2375_v46 = vadd.f32 %v147_v45, %v74_v43 }
 0x216   :  { %331 = vrot.lane.b32.xlu1 %v2375_v46, %s2271_s5  ;;  %163 = vrot.lane.b32.xlu0 %v2375_v46, %s2272_s9 }
 0x21a   :  { %329 = vrot.lane.b32.xlu1 %v2375_v46, %s2273_s10  ;;  %496 = vrot.lane.b32.xlu0 %v2375_v46, %s2274_s11 }
 0x21e   :  { %498 = vrot.lane.b32.xlu1 %v2375_v46, %s2275_s12  ;;  %663 = vrot.lane.b32.xlu0 %v2375_v46, %s2276_s13 }
 0x222   :  { %665 = vrot.lane.b32.xlu1 %v2375_v46, %s2277_s14  ;;  %1015 = vrot.lane.b32.xlu0 %v2383_v47, %s2271_s5 }
 0x226   :  { %848 = vrot.lane.b32.xlu1 %v2383_v47, %s2272_s9  ;;  %1182 = vrot.lane.b32.xlu0 %v2383_v47, %s2275_s12 }
 0x22a   :  { %1013 = vrot.lane.b32.xlu1 %v2383_v47, %s2273_s10  ;;  %1349 = vrot.lane.b32.xlu0 %v2383_v47, %s2277_s14 }
 0x22e   :  { %1180 = vrot.lane.b32.xlu1 %v2383_v47, %s2274_s11 }
 0x232   :  { %1347 = vrot.lane.b32.xlu1 %v2383_v47, %s2276_s13 }
 0x288   :  { %v332_v48 = vpop.permute.xlu1 %331  ;;  %v164_v49 = vpop.permute.xlu0 %163 }
 0x289   :  { %1990 = vmatpush3.xpose.msk.msra.mxu1 %vm165_vm2, %v164_v49  ;;  %2000 = vmatpush3.xpose.msk.msra.mxu0 %vm165_vm2, %v332_v48 }
 0x28a   :  { %2009 = vmatprep.subr.mxu0 %v2269_v41  ;;  %1994 = vmatprep.subr.mxu1 %v2269_v41 }
 0x28c   :  { %v330_v50 = vpop.permute.xlu1 %329  ;;  %1992 = vmatmul.mubr.msk.f32.vlgmr.msra.gmra.mrb[2].mxu1 %vm165_vm2, %v2375_v46  ;;  %v497_v51 = vpop.permute.xlu0 %496 }
 0x28d   :  { %2002 = vmatmul.mubr.msk.f32.vlgmr.msra.gmra.mrb[0].mxu0 %vm165_vm2, %v330_v50  ;;  %1996 = vmatprep.mubr.msk.f32.mxu1 %vm2270_vm1, %v2269_v41 }
 0x28e   :  { %2011 = vmatprep.mubr.msk.f32.mxu0 %vm2270_vm1, %v2269_v41 }
 0x290   :  { %v499_v52 = vpop.permute.xlu1 %498  ;;  %v664_v53 = vpop.permute.xlu0 %663 }
 0x291   :  { %2010 = vmatpush3.xpose.msk.msra.mxu0 %vm165_vm2, %v499_v52 }
 0x292   :  { %2019 = vmatprep.subr.mxu0 %v2269_v41 }
 0x294   :  { %v666_v54 = vpop.permute.xlu1 %665  ;;  %2012 = vmatmul.mubr.msk.f32.vlgmr.msra.gmra.mrb[2].mxu0 %vm165_vm2, %v497_v51  ;;  %v1016_v55 = vpop.permute.xlu0 %1015 }
 0x295   :  { %2020 = vmatpush3.xpose.msk.msra.mxu0 %vm165_vm2, %v666_v54  ;;  %2021 = vmatprep.mubr.msk.f32.mxu0 %vm2270_vm1, %v2269_v41 }
 0x296   :  { %2029 = vmatprep.subr.mxu0 %v2269_v41 }
 0x298   :  { %v849_v56 = vpop.permute.xlu1 %848  ;;  %2022 = vmatmul.mubr.msk.f32.vlgmr.msra.gmra.mrb[4].mxu0 %vm165_vm2, %v664_v53  ;;  %v1183_v58 = vpop.permute.xlu0 %1182 }
 0x299   :  { %2030 = vmatpush3.xpose.msk.msra.mxu0 %vm165_vm2, %v849_v56  ;;  %2031 = vmatprep.mubr.msk.f32.mxu0 %vm2270_vm1, %v2269_v41 }
 0x29a   :  { %2039 = vmatprep.subr.mxu0 %v2269_v41 }
 0x29c   :  { %v1014_v57 = vpop.permute.xlu1 %1013  ;;  %2032 = vmatmul.mubr.msk.f32.vlgmr.msra.gmra.mrb[6].mxu0 %vm165_vm2, %v2383_v47  ;;  %v1350_v60 = vpop.permute.xlu0 %1349 }
 0x29d   :  { %2040 = vmatpush3.xpose.msk.msra.mxu0 %vm165_vm2, %v1016_v55  ;;  %2041 = vmatprep.mubr.msk.f32.mxu0 %vm2270_vm1, %v2269_v41 }
 0x29e   :  { %2049 = vmatprep.subr.mxu0 %v2269_v41 }
 0x2a0   :  { %2042 = vmatmul.mubr.msk.f32.vlgmr.msra.gmra.mrb[8].mxu0 %vm165_vm2, %v1014_v57  ;;  %v1181_v59 = vpop.permute.xlu1 %1180 }
 0x2a1   :  { %2050 = vmatpush3.xpose.msk.msra.mxu0 %vm165_vm2, %v1183_v58  ;;  %2051 = vmatprep.mubr.msk.f32.mxu0 %vm2270_vm1, %v2269_v41 }
 0x2a2   :  { %2059 = vmatprep.subr.mxu0 %v2269_v41 }
 0x2a4   :  { %2052 = vmatmul.mubr.msk.f32.vlgmr.msra.gmra.mrb[10].mxu0 %vm165_vm2, %v1181_v59  ;;  %v1348_v61 = vpop.permute.xlu1 %1347 }
 0x2a5   :  { %2060 = vmatpush3.xpose.msk.msra.mxu0 %vm165_vm2, %v1350_v60  ;;  %2061 = vmatprep.mubr.msk.f32.mxu0 %vm2270_vm1, %v2269_v41 }
 0x2a8   :  { %2062 = vmatmul.mubr.msk.f32.vlgmr.msra.gmra.mrb[12].mxu0 %vm165_vm2, %v1348_v61 }
 0x35f   :  { %v236_v63 = vpop.f32.mrb[2].mxu1 }
 0x360   :  { %v240_v4 = vmul.f32 0.35355338, %v236_v63  ;;  %v1993_v5 = vpop.f32.mrb[3].mxu1  ;;  %v403_v6 = vpop.f32.mrb[0].mxu0 }
 0x361   :  { %v407_v7 = vmul.f32 0.35355338, %v403_v6  ;;  %v2003_v8 = vpop.f32.mrb[1].mxu0 }
 0x362   :  { %v241_v9 = vadd.f32 %v240_v4, %v161_v3 }
 0x363   :  { %v408_v10 = vadd.f32 %v407_v7, %v161_v3 }
 0x364   :  { %v242_v11 = vsel %vm165_vm2, %v241_v9, -inf }
 0x365   :  { %243 = vmax.xlane.f32.xlu0 %v242_v11  ;;  %v409_v12 = vsel %vm165_vm2, %v408_v10, -inf }
 0x366   :  { %410 = vmax.xlane.f32.xlu1 %v409_v12 }
 0x367   :  { %v570_v13 = vpop.f32.mrb[2].mxu0 }
 0x368   :  { %v574_v14 = vmul.f32 0.35355338, %v570_v13  ;;  %v2013_v15 = vpop.f32.mrb[3].mxu0 }
 0x36a   :  { %v2436_v16 = vadd.f32 %v574_v14, %v161_v3 }
 0x36b   :  { %v737_v17 = vpop.f32.mrb[4].mxu0 }
 0x36c   :  { %v741_v18 = vmul.f32 0.35355338, %v737_v17  ;;  %v2023_v19 = vpop.f32.mrb[5].mxu0  ;;  %v576_v20 = vsel %vm165_vm2, %v2436_v16, -inf }
 0x36d   :  { %577 = vmax.xlane.f32.xlu0 %v576_v20 }
 0x36e   :  { %v742_v21 = vadd.f32 %v741_v18, %v161_v3 }
 0x36f   :  { %v920_v22 = vpop.f32.mrb[6].mxu0 }
 0x370   :  { %v924_v23 = vmul.f32 0.35355338, %v920_v22  ;;  %v2033_v24 = vpop.f32.mrb[7].mxu0  ;;  %v743_v25 = vsel %vm165_vm2, %v742_v21, -inf }
 0x371   :  { %744 = vmax.xlane.f32.xlu0 %v743_v25 }
 0x372   :  { %v2441_v27 = vadd.f32 %v924_v23, %v161_v3 }
 0x373   :  { %v1087_v28 = vpop.f32.mrb[8].mxu0 }
 0x374   :  { %v1091_v30 = vmul.f32 0.35355338, %v1087_v28  ;;  %v2043_v31 = vpop.f32.mrb[9].mxu0  ;;  %v926_v32 = vsel %vm165_vm2, %v2441_v27, -inf }
 0x375   :  { %927 = vmax.xlane.f32.xlu0 %v926_v32 }
 0x376   :  { %v1092_v33 = vadd.f32 %v1091_v30, %v161_v3 }
 0x377   :  { %v1254_v34 = vpop.f32.mrb[10].mxu0 }
 0x378   :  { %v1258_v35 = vmul.f32 0.35355338, %v1254_v34  ;;  %v2053_v36 = vpop.f32.mrb[11].mxu0  ;;  %v1093_v37 = vsel %vm165_vm2, %v1092_v33, -inf }
 0x379   :  { %1094 = vmax.xlane.f32.xlu1 %v1093_v37 }
 0x37a   :  { %v1259_v38 = vadd.f32 %v1258_v35, %v161_v3 }
 0x37b   :  { %v1421_v39 = vpop.f32.mrb[12].mxu0 }
 0x37c   :  { %v1425_v40 = vmul.f32 0.35355338, %v1421_v39  ;;  %v2063_v42 = vpop.f32.mrb[13].mxu0  ;;  %v1260_v43 = vsel %vm165_vm2, %v1259_v38, -inf }
 0x37d   :  { %1261 = vmax.xlane.f32.xlu0 %v1260_v43 }
 0x37e   :  { %v1426_v44 = vadd.f32 %v1425_v40, %v161_v3 }
 0x380   :  { %v1427_v45 = vsel %vm165_vm2, %v1426_v44, -inf }
 0x38a   :  { %253 = vrot.lane.b32.xlu1 %v2375_v46, %s2279_s15 }
 0x3ae   :  { %1428 = vmax.xlane.f32.xlu1 %v1427_v45 }
 0x3bf   :  { %587 = vrot.lane.b32.xlu1 %v2375_v46, %s2280_s16 }
 0x3c3   :  { %754 = vrot.lane.b32.xlu1 %v2375_v46, %s2281_s17 }
 0x3c7   :  { %937 = vrot.lane.b32.xlu1 %v2383_v47, %s2279_s15 }
 0x3f2   :  { %v244_v48 = vpop.xlane.xlu0 %243 }
 0x3f3   :  { %v245_v49 = vsub.f32 %v241_v9, %v244_v48  ;;  %v411_v50 = vpop.xlane.xlu1 %410 }
 0x3f4   :  { %v412_v51 = vsub.f32 %v408_v10, %v411_v50 }
 0x3f5   :  { %v246_v52 = vmul.f32 1.442695, %v245_v49 }
 0x3f6   :  { %v413_v53 = vmul.f32 1.442695, %v412_v51 }
 0x3f7   :  { %2205 = vpow2.f32 %v246_v52 }
 0x3f8   :  { %2207 = vpow2.f32 %v413_v53 }
 0x3fa   :  { %v578_v54 = vpop.xlane.xlu0 %577 }
 0x3fb   :  { %v579_v4 = vsub.f32 %v2436_v16, %v578_v54 }
 0x3fd   :  { %v580_v6 = vmul.f32 1.442695, %v579_v4  ;;  %v1530_v4 = vld [vmem:[%s2638_s2 + $0x8] sm:$0xff] }
 0x3fe   :  { %v745_v55 = vpop.xlane.xlu0 %744 }
 0x3ff   :  { %v746_v56 = vsub.f32 %v742_v21, %v745_v55 }
 0x401   :  { %v2206_v57 = vpop.eup %2205  ;;  %v747_v58 = vmul.f32 1.442695, %v746_v56 }
 0x402   :  { %v2454_v59 = vpop.eup %2207  ;;  %v248_v60 = vsel %vm165_vm2, %v2206_v57, 0.0  ;;  %v928_v5 = vpop.xlane.xlu0 %927 }
 0x403   :  { %2209 = vpow2.f32 %v747_v58  ;;  %249 = vadd.xlane.f32.xlu0 %v248_v60  ;;  %v415_v61 = vsel %vm165_vm2, %v2454_v59, 0.0  ;;  %v929_v7 = vsub.f32 %v2441_v27, %v928_v5 }
 0x404   :  { %416 = vadd.xlane.f32.xlu1 %v415_v61  ;;  %2211 = vpow2.f32 %v580_v6 }
 0x405   :  { %v930_v9 = vmul.f32 1.442695, %v929_v7  ;;  %v1531_v7 = vld [vmem:[%s2638_s2 + $0x10] sm:$0xff] }
 0x406   :  { %v1095_v62 = vpop.xlane.xlu1 %1094 }
 0x407   :  { %2213 = vpow2.f32 %v930_v9  ;;  %v1096_v11 = vsub.f32 %v1092_v33, %v1095_v62 }
 0x409   :  { %v1097_v13 = vmul.f32 1.442695, %v1096_v11 }
 0x40a   :  { %v254_v63 = vpop.permute.xlu1 %253  ;;  %v1262_v8 = vpop.xlane.xlu0 %1261 }
 0x40b   :  { %1995 = vmatpush3.msra.mxu1 %v254_v63  ;;  %v1263_v10 = vsub.f32 %v1259_v38, %v1262_v8  ;;  %v1532_v8 = vld [vmem:[%s2638_s2 + $0x18] sm:$0xff] }
 0x40c   :  { %2004 = vmatprep.subr.mxu1 %v2269_v41 }
 0x40d   :  { %v2460_v2 = vpop.eup %2209  ;;  %v1264_v12 = vmul.f32 1.442695, %v1263_v10  ;;  %v2138_v10 = vpack.c.bf16 %v1532_v8, %v1531_v7 }
 0x40e   :  { %v749_v3 = vsel %vm165_vm2, %v2460_v2, 0.0  ;;  %v2212_v14 = vpop.eup %2211 }
 0x40f   :  { %750 = vadd.xlane.f32.xlu1 %v749_v3  ;;  %2215 = vpow2.f32 %v1264_v12  ;;  %v1529_v3 = vld [vmem:[%s2638_s2] sm:$0xff] }
 0x410   :  { %2217 = vpow2.f32 %v1097_v13  ;;  %v2134_v5 = vpack.c.bf16 %v1530_v4, %v1529_v3  ;;  %v1648_v3 = vsub.s32 4, %v2354_v26  ;;  %v1654_v4 = vsub.s32 5, %v2354_v26 }
 0x411   :  { %v2214_v15 = vpop.eup %2213 }
 0x412   :  { %v932_v17 = vsel %vm165_vm2, %v2214_v15, 0.0  ;;  %v1655_v7 = vrot.slane %v2360_v29, %v1654_v4 }
 0x419   :  { %420 = vrot.lane.b32.xlu0 %v2375_v46, %s2282_s18  ;;  %v582_v46 = vsel %vm165_vm2, %v2212_v14, 0.0  ;;  %v2470_v18 = vpop.eup %2215 }
 0x41a   :  { %v1266_v21 = vsel %vm165_vm2, %v2470_v18, 0.0  ;;  %v2218_v22 = vpop.eup %2217 }
 0x41b   :  { %v1099_v23 = vsel %vm165_vm2, %v2218_v22, 0.0 }
 0x420   :  { %1104 = vrot.lane.b32.xlu1 %v2383_v47, %s2282_s18 }
 0x438   :  { %583 = vadd.xlane.f32.xlu0 %v582_v46 }
 0x43b   :  { %v1429_v16 = vpop.xlane.xlu1 %1428 }
 0x43c   :  { %v1430_v19 = vsub.f32 %v1426_v44, %v1429_v16  ;;  %933 = vadd.xlane.f32.xlu0 %v932_v17 }
 0x43e   :  { %v1431_v20 = vmul.f32 1.442695, %v1430_v19 }
 0x43f   :  { %v588_v27 = vpop.permute.xlu1 %587 }
 0x440   :  { %2219 = vpow2.f32 %v1431_v20  ;;  %1267 = vadd.xlane.f32.xlu0 %v1266_v21 }
 0x443   :  { %v755_v28 = vpop.permute.xlu1 %754 }
 0x444   :  { %1100 = vadd.xlane.f32.xlu1 %v1099_v23 }
 0x447   :  { %v938_v30 = vpop.permute.xlu1 %937 }
 0x44a   :  { %v2475_v24 = vpop.eup %2219 }
 0x44b   :  { %v1433_v25 = vsel %vm165_vm2, %v2475_v24, 0.0 }
 0x44c   :  { %1434 = vadd.xlane.f32.xlu0 %v1433_v25 }
 0x455   :  { %1438 = vrot.lane.b32.xlu1 %v2383_v47, %s2281_s17 }
 0x462   :  { %1271 = vrot.lane.b32.xlu0 %v2383_v47, %s2280_s16 }
 0x490   :  { %v250_v31 = vpop.xlane.xlu0 %249 }
 0x491   :  { %2221 = vrcp.f32 %v250_v31  ;;  %v417_v32 = vpop.xlane.xlu1 %416 }
 0x492   :  { %2223 = vrcp.f32 %v417_v32 }
 0x494   :  { %v421_v36 = vpop.permute.xlu0 %420 }
 0x49b   :  { %v2222_v33 = vpop.eup %2221 }
 0x49c   :  { %v252_v34 = vmul.f32 %v2222_v33, %v2206_v57  ;;  %v2224_v35 = vpop.eup %2223  ;;  %v751_v47 = vpop.xlane.xlu1 %750  ;;  %v1535_v33 = vsub.s32 1, %v2354_v26 }
 0x49d   :  { %v419_v37 = vmul.f32 %v2224_v35, %v2454_v59 }
 0x49e   :  { %1997 = vmatmul.mubr.msk.f32.vlgmr.msra.gmra.mrb[4].mxu1 %vm165_vm2, %v252_v34  ;;  %v1536_v34 = vrot.slane %v2360_v29, %v1535_v33  ;;  %v1777_v33 = vld [vmem:[%s2640_s4 + $0x60] sm:$0xff] }
 0x49f   :  { %2005 = vmatpush3.msra.mxu1 %v421_v36  ;;  %2006 = vmatprep.mubr.msk.f32.mxu1 %vm2270_vm1, %v2269_v41 }
 0x4a0   :  { %2014 = vmatprep.subr.mxu1 %v2269_v41  ;;  %v1105_v40 = vpop.permute.xlu1 %1104 }
 0x4a2   :  { %2007 = vmatmul.mubr.msk.f32.vlgmr.msra.gmra.mrb[6].mxu1 %vm165_vm2, %v419_v37 }
 0x4a3   :  { %2015 = vmatpush3.msra.mxu1 %v588_v27  ;;  %2016 = vmatprep.mubr.msk.f32.mxu1 %vm2270_vm1, %v2269_v41 }
 0x4a4   :  { %2024 = vmatprep.subr.mxu1 %v2269_v41 }
 0x4c5   :  { %v584_v38 = vpop.xlane.xlu0 %583 }
 0x4c6   :  { %2225 = vrcp.f32 %v584_v38 }
 0x4c7   :  { %2227 = vrcp.f32 %v751_v47 }
 0x4c9   :  { %v934_v39 = vpop.xlane.xlu0 %933 }
 0x4ca   :  { %2229 = vrcp.f32 %v934_v39 }
 0x4cd   :  { %v1268_v44 = vpop.xlane.xlu0 %1267 }
 0x4d0   :  { %v2226_v42 = vpop.eup %2225 }
 0x4d1   :  { %v586_v43 = vmul.f32 %v2226_v42, %v2212_v14  ;;  %v1101_v45 = vpop.xlane.xlu1 %1100  ;;  %v2228_v48 = vpop.eup %2227 }
 0x4d2   :  { %2231 = vrcp.f32 %v1101_v45  ;;  %v753_v49 = vmul.f32 %v2228_v48, %v2460_v2 }
 0x4d3   :  { %2017 = vmatmul.mubr.msk.f32.vlgmr.msra.gmra.mrb[8].mxu1 %vm165_vm2, %v586_v43  ;;  %2233 = vrcp.f32 %v1268_v44 }
 0x4d4   :  { %2025 = vmatpush3.msra.mxu1 %v755_v28  ;;  %2026 = vmatprep.mubr.msk.f32.mxu1 %vm2270_vm1, %v2269_v41  ;;  %v2230_v50 = vpop.eup %2229 }
 0x4d5   :  { %2034 = vmatprep.subr.mxu1 %v2269_v41  ;;  %v936_v51 = vmul.f32 %v2230_v50, %v2214_v15  ;;  %v1439_v58 = vpop.permute.xlu1 %1438 }
 0x4d7   :  { %2027 = vmatmul.mubr.msk.f32.vlgmr.msra.gmra.mrb[10].mxu1 %vm165_vm2, %v753_v49 }
 0x4d8   :  { %2035 = vmatpush3.msra.mxu1 %v938_v30  ;;  %2036 = vmatprep.mubr.msk.f32.mxu1 %vm2270_vm1, %v2269_v41 }
 0x4d9   :  { %v1435_v52 = vpop.xlane.xlu0 %1434  ;;  %2044 = vmatprep.subr.mxu1 %v2269_v41 }
 0x4da   :  { %2235 = vrcp.f32 %v1435_v52 }
 0x4db   :  { %2037 = vmatmul.mubr.msk.f32.vlgmr.msra.gmra.mrb[12].mxu1 %vm165_vm2, %v936_v51 }
 0x4dc   :  { %v2232_v53 = vpop.eup %2231  ;;  %2045 = vmatpush3.msra.mxu1 %v1105_v40  ;;  %2046 = vmatprep.mubr.msk.f32.mxu1 %vm2270_vm1, %v2269_v41 }
 0x4dd   :  { %v1103_v54 = vmul.f32 %v2232_v53, %v2218_v22  ;;  %v1272_v55 = vpop.permute.xlu0 %1271  ;;  %2054 = vmatprep.subr.mxu1 %v2269_v41  ;;  %v2234_v56 = vpop.eup %2233  ;;  %v1658_v53 = vld [vmem:[%s2639_s3] sm:$0xff] }
 0x4de   :  { %v1270_v57 = vmul.f32 %v2234_v56, %v2470_v18  ;;  %v1660_v56 = vld [vmem:[%s2639_s3 + $0x10] sm:$0xff] }
 0x4df   :  { %2047 = vmatmul.mubr.msk.f32.vlgmr.msra.gmra.mrb[14].mxu1 %vm165_vm2, %v1103_v54  ;;  %v1659_v54 = vld [vmem:[%s2639_s3 + $0x8] sm:$0xff] }
 0x4e0   :  { %2055 = vmatpush3.msra.mxu1 %v1272_v55  ;;  %2056 = vmatprep.mubr.msk.f32.mxu1 %vm2270_vm1, %v2269_v41  ;;  %v2142_v55 = vpack.c.bf16 %v1659_v54, %v1658_v53 }
 0x4e1   :  { %2064 = vmatprep.subr.mxu1 %v2269_v41 }
 0x4e3   :  { %2057 = vmatmul.mubr.msk.f32.vlgmr.msra.gmra.mrb[16].mxu1 %vm165_vm2, %v1270_v57  ;;  %v1661_v57 = vld [vmem:[%s2639_s3 + $0x18] sm:$0xff] }
 0x4e4   :  { %v2236_v59 = vpop.eup %2235  ;;  %2065 = vmatpush3.msra.mxu1 %v1439_v58  ;;  %2066 = vmatprep.mubr.msk.f32.mxu1 %vm2270_vm1, %v2269_v41  ;;  %v2146_v58 = vpack.c.bf16 %v1661_v57, %v1660_v56 }
 0x4e5   :  { %v1437_v60 = vmul.f32 %v2236_v59, %v2475_v24  ;;  %2135 = vmatprep.subr.bf16.mxu1 %v2134_v5 }
 0x4e7   :  { %2067 = vmatmul.mubr.msk.f32.vlgmr.msra.gmra.mrb[18].mxu1 %vm165_vm2, %v1437_v60 }
 0x4e8   :  { %2137 = vmatpush3.bf16.msra.mxu1 %v2134_v5 }
 0x4e9   :  { %2139 = vmatprep.subr.bf16.mxu1 %v2138_v10 }
 0x4ec   :  { %2141 = vmatpush3.bf16.msra.mxu1 %v2138_v10 }
 0x4ed   :  { %2143 = vmatprep.subr.bf16.mxu1 %v2142_v55 }
 0x571   :  { %v325_v61 = vpop.f32.mrb[4].mxu1 }
 0x572   :  { %v1998_v62 = vpop.f32.mrb[5].mxu1 }
 0x575   :  { %v492_v63 = vpop.f32.mrb[6].mxu1 }
 0x576   :  { %831 = vrot.lane.b32.xlu0 %v492_v63, %s2283_s19  ;;  %v2008_v2 = vpop.f32.mrb[7].mxu1 }
 0x5a6   :  { %v659_v41 = vpop.f32.mrb[8].mxu1 }
 0x5a7   :  { %835 = vrot.lane.b32.xlu1 %v659_v41, %s2284_s24  ;;  %v2018_v6 = vpop.f32.mrb[9].mxu1  ;;  %v1649_v41 = vrot.slane %v2360_v29, %v1648_v3  ;;  %v1783_v3 = vsub.s32 7, %v2354_v26 }
 0x5a9   :  { %v1784_v4 = vrot.slane %v2360_v29, %v1783_v3 }
 0x5aa   :  { %v826_v9 = vpop.f32.mrb[10].mxu1 }
 0x5ab   :  { %839 = vrot.lane.b32.xlu1 %v826_v9, %s2285_s28  ;;  %v2028_v11 = vpop.f32.mrb[11].mxu1 }
 0x5ae   :  { %v1009_v12 = vpop.f32.mrb[12].mxu1 }
 0x5af   :  { %v2038_v13 = vpop.f32.mrb[13].mxu1 }
 0x5b2   :  { %v1176_v14 = vpop.f32.mrb[14].mxu1 }
 0x5b3   :  { %1515 = vrot.lane.b32.xlu0 %v1176_v14, %s2283_s19  ;;  %v2048_v46 = vpop.f32.mrb[15].mxu1  ;;  %v1765_v14 = vld [vmem:[%s2640_s4] sm:$0xff] }
 0x5b4   :  { %v1766_v46 = vld [vmem:[%s2640_s4 + $0x8] sm:$0xff] }
 0x5b6   :  { %v1343_v15 = vpop.f32.mrb[16].mxu1 }
 0x5b7   :  { %1519 = vrot.lane.b32.xlu0 %v1343_v15, %s2284_s24  ;;  %v2058_v16 = vpop.f32.mrb[17].mxu1  ;;  %v2150_v15 = vpack.c.bf16 %v1766_v46, %v1765_v14 }
 0x5b8   :  { %v1767_v16 = vld [vmem:[%s2640_s4 + $0x10] sm:$0xff] }
 0x5b9   :  { %2151 = vmatprep.subr.bf16.mxu0 %v2150_v15 }
 0x5ba   :  { %v1510_v17 = vpop.f32.mrb[18].mxu1  ;;  %2153 = vmatpush3.bf16.msra.mxu0 %v2150_v15 }
 0x5bb   :  { %1523 = vrot.lane.b32.xlu1 %v1510_v17, %s2285_s28  ;;  %v2068_v18 = vpop.f32.mrb[19].mxu1  ;;  %v1768_v17 = vld [vmem:[%s2640_s4 + $0x18] sm:$0xff] }
 0x5bc   :  { %v2154_v18 = vpack.c.bf16 %v1768_v17, %v1767_v16 }
 0x5be   :  { %2155 = vmatprep.subr.bf16.mxu0 %v2154_v18 }
 0x5bf   :  { %2157 = vmatpush3.bf16.msra.mxu0 %v2154_v18 }
 0x5e8   :  { %v832_v19 = vpop.permute.xlu0 %831 }
 0x5e9   :  { %v842_v21 = vsel %vm165_vm2, %v325_v61, %v832_v19  ;;  %v1769_v19 = vld [vmem:[%s2640_s4 + $0x20] sm:$0xff] }
 0x619   :  { %v836_v20 = vpop.permute.xlu1 %835 }
 0x61a   :  { %v844_v22 = vsel %vm843_vm4, %v842_v21, %v836_v20  ;;  %v1770_v20 = vld [vmem:[%s2640_s4 + $0x28] sm:$0xff] }
 0x61b   :  { %v2158_v21 = vpack.c.bf16 %v1770_v20, %v1769_v19 }
 0x61d   :  { %v840_v23 = vpop.permute.xlu1 %839  ;;  %2159 = vmatprep.subr.bf16.mxu0 %v2158_v21 }
 0x61e   :  { %v846_v24 = vsel %vm845_vm5, %v844_v22, %v840_v23  ;;  %2161 = vmatpush3.bf16.msra.mxu0 %v2158_v21  ;;  %v1771_v22 = vld [vmem:[%s2640_s4 + $0x30] sm:$0xff]  ;;  %v1772_v23 = vld [vmem:[%s2640_s4 + $0x38] sm:$0xff] }
 0x61f   :  { %2077 = vmatprep.mubr.msk.f32.mxu1 %vm27_vm0, %v846_v24  ;;  %v2162_v24 = vpack.c.bf16 %v1772_v23, %v1771_v22 }
 0x621   :  { %2163 = vmatprep.subr.bf16.mxu0 %v2162_v24 }
 0x622   :  { %2165 = vmatpush3.bf16.msra.mxu0 %v2162_v24 }
 0x625   :  { %v1516_v25 = vpop.permute.xlu0 %1515 }
 0x626   :  { %v1526_v28 = vsel %vm165_vm2, %v1009_v12, %v1516_v25  ;;  %v1773_v25 = vld [vmem:[%s2640_s4 + $0x40] sm:$0xff] }
 0x629   :  { %v1520_v27 = vpop.permute.xlu0 %1519 }
 0x62a   :  { %v1527_v30 = vsel %vm843_vm4, %v1526_v28, %v1520_v27  ;;  %v1774_v27 = vld [vmem:[%s2640_s4 + $0x48] sm:$0xff]  ;;  %v1775_v28 = vld [vmem:[%s2640_s4 + $0x50] sm:$0xff] }
 0x62d   :  { %v1524_v31 = vpop.permute.xlu1 %1523 }
 0x62e   :  { %v1528_v32 = vsel %vm845_vm5, %v1527_v30, %v1524_v31  ;;  %v2166_v30 = vpack.c.bf16 %v1774_v27, %v1773_v25  ;;  %v1776_v31 = vld [vmem:[%s2640_s4 + $0x58] sm:$0xff] }
 0x62f   :  { %2078 = vmatmul.mubr.msk.f32.vlgmr.msra.gmra.mrb[20].mxu1 %vm27_vm0, %v1528_v32  ;;  %v2170_v32 = vpack.c.bf16 %v1776_v31, %v1775_v28 }
 0x630   :  { %2145 = vmatpush3.bf16.msra.mxu1 %v2142_v55  ;;  %2167 = vmatprep.subr.bf16.mxu0 %v2166_v30 }
 0x631   :  { %2147 = vmatprep.subr.bf16.mxu1 %v2146_v58  ;;  %2169 = vmatpush3.bf16.msra.mxu0 %v2166_v30 }
 0x632   :  { %2171 = vmatprep.subr.bf16.mxu0 %v2170_v32 }
 0x634   :  { %2149 = vmatpush3.bf16.msra.mxu1 %v2146_v58 }
 0x635   :  { %2173 = vmatpush3.bf16.msra.mxu0 %v2170_v32 }
 0x702   :  { %v2079_v35 = vpop.f32.mrb[20].mxu1 }
 0x703   :  { %v1615_v36 = vadd.f32 %v2079_v35, %v1536_v34  ;;  %v1609_v37 = vpop.f32.mrb[21].mxu1 }
 0x704   :  { %v1610_v47 = vadd.f32 %v1609_v37, %v1536_v34  ;;  %v1778_v34 = vld [vmem:[%s2640_s4 + $0x68] sm:$0xff]  ;;  %v1780_v37 = vld [vmem:[%s2640_s4 + $0x78] sm:$0xff] }
 0x705   :  { %v2536_v38 = vadd.f32 %v1615_v36, %v2331_v1  ;;  %v2174_v35 = vpack.c.bf16 %v1778_v34, %v1777_v33  ;;  %v1779_v36 = vld [vmem:[%s2640_s4 + $0x70] sm:$0xff]  ;;  %s2286_s4 = smov [#allocation2]  }
 0x706   :  { %v2539_v39 = vadd.f32 %v1610_v47, %v2326_v0  ;;  %v2178_v47 = vpack.c.bf16 %v1780_v37, %v1779_v36  ;;  %s1869_s13 = sshll.u32 %s2286_s4, 4  ;;  %s1870_s13 = int_to_ptr.vmem [resolvable:$true] %s1869_s13 }
 0x707   :  { %v1623_v40 = vsel %vm27_vm0, %v2536_v38, 0.0  ;;  %2175 = vmatprep.subr.bf16.mxu0 %v2174_v35  ;;  %s2245_s14 = scalar_lea.vmem %s1870_s13, 256  ;;  %p2250_p1 = scmp.lt.s32.totalorder %s1870_s13, %s1870_s13 }
 0x708   :  { %1624 = vadd.xlane.f32.xlu1 %v1623_v40  ;;  %v1620_v42 = vsel %vm27_vm0, %v2539_v39, 0.0  ;;  %2177 = vmatpush3.bf16.msra.mxu0 %v2174_v35  ;;  %v1664_v40 = vsub.s32 6, %v2354_v26  ;;  %p2246_p0 = scmp.ne.s32.totalorder %s1870_s13, %s2245_s14  ;;  %p2251_p2 = scmp.lt.s32.totalorder %s2245_s14, %s2245_s14 }
 0x709   :  { %1621 = vadd.xlane.f32.xlu0 %v1620_v42  ;;  %2179 = vmatprep.subr.bf16.mxu0 %v2178_v47 }
 0x70a   :  { %v1665_v42 = vrot.slane %v2360_v29, %v1664_v40  ;;  %p2252_p3 = por %p2251_p2, %p2250_p1 }
 0x70c   :  { %2181 = vmatpush3.bf16.msra.mxu0 %v2178_v47  ;;  %p2253_p4 = pnand %p2252_p3, %p2246_p0 }
 0x795   :  { %v1625_v43 = vpop.xlane.xlu1 %1624 }
 0x796   :  { %v1627_v44 = vmul.f32 0.03125, %v1625_v43  ;;  %v1622_v45 = vpop.xlane.xlu0 %1621 }
 0x797   :  { %v1626_v48 = vmul.f32 0.03125, %v1622_v45 }
 0x798   :  { %v1629_v49 = vsub.f32 %v2536_v38, %v1627_v44 }
 0x799   :  { %v1628_v1 = vsub.f32 %v2539_v39, %v1626_v48 }
 0x79a   :  { %v1631_v51 = vmul.f32 %v1629_v49, %v1629_v49 }
 0x79b   :  { %v1630_v50 = vmul.f32 %v1628_v1, %v1628_v1 }
 0x79c   :  { %v1635_v52 = vsel %vm27_vm0, %v1631_v51, 0.0 }
 0x79d   :  { %v1632_v0 = vsel %vm27_vm0, %v1630_v50, 0.0 }
 0x79e   :  { %1633 = vadd.xlane.f32.xlu0 %v1632_v0 }
 0x7a2   :  { %1636 = vadd.xlane.f32.xlu0 %v1635_v52 }
 0x82b   :  { %v1634_v59 = vpop.xlane.xlu0 %1633 }
 0x82c   :  { %v1638_v60 = vmul.f32 0.03125, %v1634_v59 }
 0x82e   :  { %v1640_v61 = vadd.f32 1e-05, %v1638_v60 }
 0x82f   :  { %v1637_v62 = vpop.xlane.xlu0 %1636 }
 0x830   :  { %2237 = vrsqrt.f32 %v1640_v61  ;;  %v1639_v63 = vmul.f32 0.03125, %v1637_v62 }
 0x832   :  { %v1641_v2 = vadd.f32 1e-05, %v1639_v63 }
 0x834   :  { %2239 = vrsqrt.f32 %v1641_v2 }
 0x83a   :  { %v2238_v5 = vpop.eup %2237 }
 0x83b   :  { %v1644_v6 = vmul.f32 %v2238_v5, %v1628_v1 }
 0x83d   :  { %v1650_v8 = vmul.f32 %v1649_v41, %v1644_v6 }
 0x83e   :  { %v2240_v9 = vpop.eup %2239 }
 0x83f   :  { %v1645_v10 = vmul.f32 %v2240_v9, %v1629_v49  ;;  %v1656_v11 = vadd.f32 %v1655_v7, %v1650_v8 }
 0x841   :  { %v1651_v12 = vmul.f32 %v1649_v41, %v1645_v10  ;;  %2088 = vmatprep.mubr.msk.f32.mxu1 %vm27_vm0, %v1656_v11 }
 0x843   :  { %v1657_v13 = vadd.f32 %v1655_v7, %v1651_v12 }
 0x845   :  { %2089 = vmatmul.mubr.msk.f32.vlgmr.msra.gmra.mrb[22].mxu1 %vm27_vm0, %v1657_v13 }
 0x918   :  { %v2090_v43 = vpop.f32.mrb[22].mxu1 }
 0x919   :  { %v1744_v44 = vadd.f32 %v2090_v43, %v1665_v42  ;;  %v1738_v45 = vpop.f32.mrb[23].mxu1 }
 0x91a   :  { %v1739_v48 = vadd.f32 %v1738_v45, %v1665_v42 }
 0x91b   :  { %v1748_v49 = vmul.f32 %v1744_v44, %v1744_v44 }
 0x91c   :  { %v1747_v1 = vmul.f32 %v1739_v48, %v1739_v48 }
 0x91d   :  { %v1750_v50 = vmul.f32 %v1748_v49, %v1744_v44 }
 0x91e   :  { %v1749_v0 = vmul.f32 %v1747_v1, %v1739_v48 }
 0x91f   :  { %v1752_v51 = vmul.f32 0.044715, %v1750_v50 }
 0x920   :  { %v1751_v52 = vmul.f32 0.044715, %v1749_v0 }
 0x921   :  { %v1754_v53 = vadd.f32 %v1752_v51, %v1744_v44 }
 0x922   :  { %v1753_v54 = vadd.f32 %v1751_v52, %v1739_v48 }
 0x923   :  { %v1756_v55 = vmul.f32 0.7978846, %v1754_v53 }
 0x924   :  { %v1755_v56 = vmul.f32 0.7978846, %v1753_v54 }
 0x925   :  { %2241 = vtanh.f32 %v1756_v55 }
 0x926   :  { %2243 = vtanh.f32 %v1755_v56 }
 0x92f   :  { %v2242_v57 = vpop.eup %2241 }
 0x930   :  { %v2244_v58 = vpop.eup %2243  ;;  %v1760_v59 = vadd.f32 1.0, %v2242_v57 }
 0x931   :  { %v1759_v60 = vadd.f32 1.0, %v2244_v58 }
 0x932   :  { %v1762_v61 = vmul.f32 0.5, %v1760_v59 }
 0x933   :  { %v1761_v62 = vmul.f32 0.5, %v1759_v60 }
 0x934   :  { %v1764_v2 = vmul.f32 %v1762_v61, %v1744_v44 }
 0x935   :  { %v1763_v63 = vmul.f32 %v1761_v62, %v1739_v48 }
 0x937   :  { %2123 = vmatprep.mubr.f32.mxu0 %v1763_v63 }
 0x938   :  { %2124 = vmatmul.mubr.f32.vlgmr.msra.gmra.mrb[14].mxu0 %v1764_v2 }
 0xa0b   :  { %v2125_v41 = vpop.f32.mrb[14].mxu0 }
 0xa0c   :  { %v1857_v5 = vadd.f32 %v2125_v41, %v1784_v4  ;;  %v1851_v6 = vpop.f32.mrb[15].mxu0 }
 0xa0d   :  { %v1852_v7 = vadd.f32 %v1851_v6, %v1784_v4 }
 0xa0e   :  { %v1861_v8 = vadd.f32 %v1857_v5, %v2536_v38 }
 0xa0f   :  { %v1860_v9 = vadd.f32 %v1852_v7, %v2539_v39 }
 0xa10   :  { %1863 = vst.msk [vmem:[#allocation2 + $0x8] sm:$0xff] %vm27_vm0, %v1861_v8 }
 0xa11   :  { %1862 = vst.msk [vmem:[#allocation2] sm:$0xff] %vm27_vm0, %v1860_v9 }
 0xa12   :  { %2256 = shalt.err (!%p2253_p4)
}
 0xa13   :  { %s2257_s17 = scalar_lea.hbm %s2642_s6, 256 }
 0xa14   :  { %p2258_p5 = scmp.ne.s32.totalorder %s2642_s6, %s2257_s17  ;;  %p2261_p6 = scmp.lt.u32.totalorder %s2257_s17, %s2642_s6 }
 0xa16   :  { %p2263_p7 = pnand %p2261_p6, %p2258_p5 }
 0xa18   :  { %2266 = shalt.err (!%p2263_p7)
}
 0xa19   :  { %s2287_s23 = smov 128  }
 0xa1a   :  { %1875 = dma.vmem_to_hbm [thread:$0]  %s1870_s13, 256, %s2642_s6, [#allocation3], %s2287_s23, %s2287_s23, %s2283_s19  }
 0xa1b   :  { %2267 = dma.done.wait [#allocation3], 256  }
 0xa1c   :  { %2268 = vsyncadd [#allocation3], 4294967040 }
 0xa1d   :  { %1879 = vsyncpa [#allocation3], 1 }

</bundles_post_ra>
